<compile_context>
chip_gen: v7x
topology: tpu7x:2x2x1
jax: 0.10.0
libtpu: 0.0.40
codegen_flags: <defaults>
</compile_context>

<pallas_src>
import functools

import jax
import jax.numpy as jnp
from jax.experimental import pallas as pl
from jax.experimental.pallas import tpu as pltpu

INLIERS_CLS_LOSS_WEIGHT = 0.5  # args.inliers_cls_loss_weight (deterministic, in-script)

_OUT_LANES = 128  # lane-dense output block width (only lanes 0..3 carry data)


def _round_up(x, m):
    return (x + m - 1) // m * m


def _make_kernel(B, N, tb, tn, accumulate):
    """Build the per-tile reduction kernel (shapes/flags are trace-time static)."""
    need_col_mask = (N % tn) != 0
    need_row_mask = (B % tb) != 0

    def kernel(pred_ref, gt_ref, valid_ref, out_ref):
        j = pl.program_id(1)

        pred = pred_ref[...]
        valid = valid_ref[...] > 0.5

        # Ragged-tail masking (only emitted when the tile doesn't divide B / N).
        if need_col_mask:
            col = jax.lax.broadcasted_iota(jnp.int32, (tb, tn), 1)
            valid = jnp.logical_and(valid, (j * tn + col) < N)
        if need_row_mask:
            i = pl.program_id(0)
            row = jax.lax.broadcasted_iota(jnp.int32, (tb, tn), 0)
            valid = jnp.logical_and(valid, (i * tb + row) < B)

        is_out = jnp.logical_and(gt_ref[...] > 0.5, valid)

        # Single-log BCE (exact for hard 0/1 labels), clamped at -100 like
        # torch.nn.functional.binary_cross_entropy. `where` (not multiply) keeps
        # NaNs from garbage tail values out of the sums.
        sel = jnp.where(is_out, pred, 1.0 - pred)
        err = jnp.maximum(jnp.log(sel), -100.0)
        err = jnp.where(valid, -err, 0.0)

        out_sum = jnp.sum(jnp.where(is_out, err, 0.0), axis=1, keepdims=True)  # (tb, 1)
        out_cnt = jnp.sum(is_out.astype(jnp.float32), axis=1, keepdims=True)
        tot_sum = jnp.sum(err, axis=1, keepdims=True)                          # err==0 where invalid
        tot_cnt = jnp.sum(valid.astype(jnp.float32), axis=1, keepdims=True)

        lane = jax.lax.broadcasted_iota(jnp.int32, (tb, _OUT_LANES), 1)
        packed = jnp.where(lane == 0, out_sum,
                 jnp.where(lane == 1, out_cnt,
                 jnp.where(lane == 2, tot_sum,
                 jnp.where(lane == 3, tot_cnt, 0.0))))

        if accumulate:
            @pl.when(j == 0)
            def _():
                out_ref[...] = jnp.zeros_like(out_ref)
            out_ref[...] += packed
        else:
            out_ref[...] = packed[None]

    return kernel


def classification_loss(pred_outliers, gt_outliers, valid_mask, *, tb=None, tn=None):
    """pred_outliers, gt_outliers, valid_mask: [B, N] float32. Returns scalar f32 loss."""
    B, N = pred_outliers.shape

    pred = pred_outliers.astype(jnp.float32)
    gt = gt_outliers.astype(jnp.float32)
    valid = valid_mask.astype(jnp.float32)
    # TODO(synk): optionally accept bf16 probabilities (or logits + log-sigmoid BCE)
    # to halve the dominant pred stream; kept f32 here for exact reference parity.

    # Tile selection: lane tile multiple of 128 (default up to 4096); batch tile
    # equal to B when B <= 8, else a multiple of 8 (f32 sublane), up to 128.
    if tn is None:
        tn = min(4096, _round_up(N, 128))
    if tb is None:
        tb = B if B <= 8 else min(128, _round_up(B, 8))
    assert tn % 128 == 0
    assert tb == B or tb % 8 == 0

    n_bt = pl.cdiv(B, tb)
    # v7x megacore: keep >= 2 blocks on a "parallel" axis when the batch axis collapses.
    if n_bt == 1 and pl.cdiv(N, tn) < 2 and N >= 1024:
        tn = max(512, _round_up(pl.cdiv(N, 2), 128))
    n_nt = pl.cdiv(N, tn)

    # Accumulate over the N-tile axis in-kernel only when it saves output traffic
    # AND a parallel batch axis remains for megacore sharding.
    accumulate = (n_bt >= 2) and (n_nt >= 4)

    Bp = n_bt * tb
    if accumulate:
        out_shape = jax.ShapeDtypeStruct((Bp, _OUT_LANES), jnp.float32)
        out_spec = pl.BlockSpec((tb, _OUT_LANES), lambda i, j: (i, 0))
        dims = ("parallel", "arbitrary")
    else:
        out_shape = jax.ShapeDtypeStruct((n_nt, Bp, _OUT_LANES), jnp.float32)
        out_spec = pl.BlockSpec((1, tb, _OUT_LANES), lambda i, j: (j, i, 0))
        dims = ("parallel", "parallel")

    partials = pl.pallas_call(
        _make_kernel(B, N, tb, tn, accumulate),
        out_shape=out_shape,
        grid=(n_bt, n_nt),
        in_specs=[
            pl.BlockSpec((tb, tn), lambda i, j: (i, j)),   # pred
            pl.BlockSpec((tb, tn), lambda i, j: (i, j)),   # gt
            pl.BlockSpec((tb, tn), lambda i, j: (i, j)),   # valid
        ],
        out_specs=out_spec,
        compiler_params=pltpu.CompilerParams(
            dimension_semantics=dims,
            vmem_limit_bytes=32 << 20,
        ),
    )(pred, gt, valid)

    # Tiny wrapper-side combine (a few hundred floats).
    summed = partials if accumulate else jnp.sum(partials, axis=0)   # (Bp, 128)
    out_sum = summed[:B, 0]
    out_cnt = summed[:B, 1]
    tot_sum = summed[:B, 2]
    tot_cnt = summed[:B, 3]
    in_sum = tot_sum - out_sum
    in_cnt = tot_cnt - out_cnt

    outliers_err = out_sum / jnp.maximum(out_cnt, 1.0)
    inliers_err = in_sum / jnp.maximum(in_cnt, 1.0)
    batch_err = outliers_err + inliers_err * INLIERS_CLS_LOSS_WEIGHT
    return jnp.mean(batch_err)                # divides by the TRUE batch size B


def _reference_loss(pred, gt, valid):
    """Plain-JAX reference mirroring the PyTorch forward."""
    log_p = jnp.maximum(jnp.log(pred), -100.0)
    log_1mp = jnp.maximum(jnp.log(1.0 - pred), -100.0)
    err = -(gt * log_p + (1.0 - gt) * log_1mp)
    out_mask = gt * valid
    in_mask = (1.0 - gt) * valid
    outliers_err = jnp.sum(err * out_mask, axis=1) / jnp.maximum(jnp.sum(out_mask, axis=1), 1.0)
    inliers_err = jnp.sum(err * in_mask, axis=1) / jnp.maximum(jnp.sum(in_mask, axis=1), 1.0)
    batch_err = outliers_err + inliers_err * INLIERS_CLS_LOSS_WEIGHT
    return jnp.mean(batch_err)


def _make_inputs(key, B, N, lengths):
    k1, k2 = jax.random.split(key, 2)
    pred = jax.nn.sigmoid(jax.random.normal(k1, (B, N), dtype=jnp.float32))
    gt = (jax.random.uniform(k2, (B, N)) < 0.3).astype(jnp.float32)
    valid = (jnp.arange(N)[None, :] < lengths[:, None]).astype(jnp.float32)
    return pred, gt, valid


if __name__ == "__main__":
    key = jax.random.PRNGKey(0)
    k_a, k_b = jax.random.split(key, 2)

    # --- Test 1: tiny batch (B=2), partial-emission path, multi lane-tile grid ---
    B, N = 2, 1024
    lengths = jnp.array([1024, 768], dtype=jnp.int32)
    pred, gt, valid = _make_inputs(k_a, B, N, lengths)

    loss_fn = jax.jit(functools.partial(classification_loss, tn=512))
    loss = jax.block_until_ready(loss_fn(pred, gt, valid))
    ref = _reference_loss(pred, gt, valid)
    assert jnp.allclose(loss, ref, atol=1e-5, rtol=1e-4), (loss, ref)

    # --- Test 2: larger batch, in-kernel N-tile accumulation path (ragged tail) ---
    B2, N2 = 16, 2000  # N2 not a tile multiple -> exercises in-kernel tail masking
    lengths2 = (N2 - 64 * jnp.arange(B2, dtype=jnp.int32)).astype(jnp.int32)
    pred2, gt2, valid2 = _make_inputs(k_b, B2, N2, lengths2)

    loss_fn2 = jax.jit(functools.partial(classification_loss, tb=8, tn=512))
    loss2 = jax.block_until_ready(loss_fn2(pred2, gt2, valid2))
    ref2 = _reference_loss(pred2, gt2, valid2)
    assert jnp.allclose(loss2, ref2, atol=1e-5, rtol=1e-4), (loss2, ref2)

    print("KERNEL_OK")
</pallas_src>

<mosaic_0001>
module attributes {stable_mosaic.version = 11 : i64} {
  func.func @kernel(%arg0: i32, %arg1: i32, %arg2: memref<2x512xf32, #tpu.memory_space<vmem>>, %arg3: memref<2x512xf32, #tpu.memory_space<vmem>>, %arg4: memref<2x512xf32, #tpu.memory_space<vmem>>, %arg5: memref<1x2x128xf32, #tpu.memory_space<vmem>>) attributes {dimension_semantics = [#tpu.dimension_semantics<parallel>, #tpu.dimension_semantics<parallel>], iteration_bounds = array<i64: 1, 2>, scalar_prefetch = 0 : i64, scratch_operands = 0 : i64, tpu.core_type = #tpu.core_type<tc>, window_params = [{transform_indices = @transform_0, window_bounds = array<i64: 2, 512>}, {transform_indices = @transform_1, window_bounds = array<i64: 2, 512>}, {transform_indices = @transform_2, window_bounds = array<i64: 2, 512>}, {transform_indices = @transform_3, window_bounds = array<i64: 1, 2, 128>}]} {
    %c0 = arith.constant 0 : index
    %c0_0 = arith.constant 0 : index
    %0 = vector.load %arg2[%c0, %c0_0] : memref<2x512xf32, #tpu.memory_space<vmem>>, vector<2x512xf32>
    %c0_1 = arith.constant 0 : index
    %c0_2 = arith.constant 0 : index
    %1 = vector.load %arg4[%c0_1, %c0_2] : memref<2x512xf32, #tpu.memory_space<vmem>>, vector<2x512xf32>
    %cst = arith.constant 5.000000e-01 : f32
    %2 = vector.broadcast %cst : f32 to vector<2x512xf32>
    %3 = arith.cmpf ogt, %1, %2 : vector<2x512xf32>
    %c0_3 = arith.constant 0 : index
    %c0_4 = arith.constant 0 : index
    %4 = vector.load %arg3[%c0_3, %c0_4] : memref<2x512xf32, #tpu.memory_space<vmem>>, vector<2x512xf32>
    %cst_5 = arith.constant 5.000000e-01 : f32
    %5 = vector.broadcast %cst_5 : f32 to vector<2x512xf32>
    %6 = arith.cmpf ogt, %4, %5 : vector<2x512xf32>
    %7 = arith.andi %6, %3 : vector<2x512xi1>
    %cst_6 = arith.constant 1.000000e+00 : f32
    %8 = vector.broadcast %cst_6 : f32 to vector<2x512xf32>
    %9 = arith.subf %8, %0 : vector<2x512xf32>
    %10 = arith.select %7, %0, %9 : vector<2x512xi1>, vector<2x512xf32>
    %11 = math.log %10 : vector<2x512xf32>
    %cst_7 = arith.constant -1.000000e+02 : f32
    %12 = vector.broadcast %cst_7 : f32 to vector<2x512xf32>
    %13 = arith.maximumf %11, %12 : vector<2x512xf32>
    %cst_8 = arith.constant 0.000000e+00 : f32
    %14 = vector.broadcast %cst_8 : f32 to vector<2x512xf32>
    %15 = arith.subf %14, %13 : vector<2x512xf32>
    %cst_9 = arith.constant 0.000000e+00 : f32
    %16 = vector.broadcast %cst_9 : f32 to vector<2x512xf32>
    %17 = arith.select %3, %15, %16 : vector<2x512xi1>, vector<2x512xf32>
    %cst_10 = arith.constant 0.000000e+00 : f32
    %18 = vector.broadcast %cst_10 : f32 to vector<2x512xf32>
    %19 = arith.select %7, %17, %18 : vector<2x512xi1>, vector<2x512xf32>
    %cst_11 = arith.constant dense<0.000000e+00> : vector<2xf32>
    %20 = vector.multi_reduction <add>, %19, %cst_11 [1] : vector<2x512xf32> to vector<2xf32>
    %21 = vector.shape_cast %20 : vector<2xf32> to vector<2x1xf32>
    %22 = arith.extui %7 : vector<2x512xi1> to vector<2x512xi32>
    %23 = arith.sitofp %22 : vector<2x512xi32> to vector<2x512xf32>
    %cst_12 = arith.constant dense<0.000000e+00> : vector<2xf32>
    %24 = vector.multi_reduction <add>, %23, %cst_12 [1] : vector<2x512xf32> to vector<2xf32>
    %25 = vector.shape_cast %24 : vector<2xf32> to vector<2x1xf32>
    %cst_13 = arith.constant dense<0.000000e+00> : vector<2xf32>
    %26 = vector.multi_reduction <add>, %17, %cst_13 [1] : vector<2x512xf32> to vector<2xf32>
    %27 = vector.shape_cast %26 : vector<2xf32> to vector<2x1xf32>
    %28 = arith.extui %3 : vector<2x512xi1> to vector<2x512xi32>
    %29 = arith.sitofp %28 : vector<2x512xi32> to vector<2x512xf32>
    %cst_14 = arith.constant dense<0.000000e+00> : vector<2xf32>
    %30 = vector.multi_reduction <add>, %29, %cst_14 [1] : vector<2x512xf32> to vector<2xf32>
    %31 = vector.shape_cast %30 : vector<2xf32> to vector<2x1xf32>
    %32 = tpu.iota {dimensions = array<i32: 1>} : vector<2x128xi32>
    %c0_i32 = arith.constant 0 : i32
    %33 = vector.broadcast %c0_i32 : i32 to vector<2x128xi32>
    %34 = arith.cmpi eq, %32, %33 : vector<2x128xi32>
    %c1_i32 = arith.constant 1 : i32
    %35 = vector.broadcast %c1_i32 : i32 to vector<2x128xi32>
    %36 = arith.cmpi eq, %32, %35 : vector<2x128xi32>
    %c2_i32 = arith.constant 2 : i32
    %37 = vector.broadcast %c2_i32 : i32 to vector<2x128xi32>
    %38 = arith.cmpi eq, %32, %37 : vector<2x128xi32>
    %c3_i32 = arith.constant 3 : i32
    %39 = vector.broadcast %c3_i32 : i32 to vector<2x128xi32>
    %40 = arith.cmpi eq, %32, %39 : vector<2x128xi32>
    %cst_15 = arith.constant 0.000000e+00 : f32
    %41 = vector.shape_cast %31 : vector<2x1xf32> to vector<2x1xf32>
    %42 = vector.broadcast %41 : vector<2x1xf32> to vector<2x128xf32>
    %43 = vector.broadcast %cst_15 : f32 to vector<2x128xf32>
    %44 = arith.select %40, %42, %43 : vector<2x128xi1>, vector<2x128xf32>
    %45 = vector.shape_cast %27 : vector<2x1xf32> to vector<2x1xf32>
    %46 = vector.broadcast %45 : vector<2x1xf32> to vector<2x128xf32>
    %47 = arith.select %38, %46, %44 : vector<2x128xi1>, vector<2x128xf32>
    %48 = vector.shape_cast %25 : vector<2x1xf32> to vector<2x1xf32>
    %49 = vector.broadcast %48 : vector<2x1xf32> to vector<2x128xf32>
    %50 = arith.select %36, %49, %47 : vector<2x128xi1>, vector<2x128xf32>
    %51 = vector.shape_cast %21 : vector<2x1xf32> to vector<2x1xf32>
    %52 = vector.broadcast %51 : vector<2x1xf32> to vector<2x128xf32>
    %53 = arith.select %34, %52, %50 : vector<2x128xi1>, vector<2x128xf32>
    %54 = vector.shape_cast %53 : vector<2x128xf32> to vector<1x2x128xf32>
    %c0_16 = arith.constant 0 : index
    %c0_17 = arith.constant 0 : index
    %c0_18 = arith.constant 0 : index
    %55 = vector.load %arg5[%c0_16, %c0_17, %c0_18] : memref<1x2x128xf32, #tpu.memory_space<vmem>>, vector<1x2x128xf32>
    tpu.vector_store %arg5[%c0_16, %c0_17, %c0_18], %54 {strides = array<i32>} : memref<1x2x128xf32, #tpu.memory_space<vmem>>, vector<1x2x128xf32>,
    return
  }
  func.func @transform_0(%arg0: i32, %arg1: i32) -> (i32, i32) {
    %c0_i32 = arith.constant 0 : i32
    return %arg0, %arg1 : i32, i32
  }
  func.func @transform_1(%arg0: i32, %arg1: i32) -> (i32, i32) {
    %c0_i32 = arith.constant 0 : i32
    return %arg0, %arg1 : i32, i32
  }
  func.func @transform_2(%arg0: i32, %arg1: i32) -> (i32, i32) {
    %c0_i32 = arith.constant 0 : i32
    return %arg0, %arg1 : i32, i32
  }
  func.func @transform_3(%arg0: i32, %arg1: i32) -> (i32, i32, i32) {
    %c0_i32 = arith.constant 0 : i32
    %c0_i32_0 = arith.constant 0 : i32
    return %arg1, %arg0, %c0_i32 : i32, i32, i32
  }
}

</mosaic_0001>

<bundles_post_ra>
// kernel: classification_loss.1
= control target key start
LH: loop header
LB: loop body
LE: loop exit
PB: predicated region body
PF: predicated region fallthrough
CT: control target
= control target key end

     0   :  { %8 = vsyncpa [#allocation3], 0  ;;  %s1076_s0 = inlined_call_operand.hbm [shape: f32[2,1024], index: 0, kind: input, shape index: {}]   ;;  %s1077_s1 = inlined_call_operand.hbm [shape: f32[2,1024], index: 1, kind: input, shape index: {}]   ;;  %s1078_s2 = inlined_call_operand.hbm [shape: f32[2,1024], index: 2, kind: input, shape index: {}]   ;;  %s1079_s3 = inlined_call_operand.vmem [shape: f32[2,2,128], index: 3, kind: output, shape index: {}]  }
   0x1   :  { %10 = vsyncpa [#allocation3 + $0x1], 0 }
   0x2   :  { %11 = vsyncpa [#allocation5], 0 }
   0x3   :  { %13 = vsyncpa [#allocation5 + $0x1], 0  ;;  %s849_s12 = smov 0   ;;  %s851_s13 = smov 0  }
   0x4   :  { %s853_s14 = smov 0   ;;  %s855_s15 = smov 0  }
   0x5   :  { %s857_s16 = smov 0   ;;  %s859_s17 = smov 0  }
   0x6 LB: > { %s584_s18 = sadd.s32 4294967295, %s822_s17   ;;  %s28_s19 = sadd.s32 1, %s818_s16  ;;  %s822_s17 = sphi %s859_s17, %s19_s17   ;;  %s818_s16 = sphi %s857_s16, %s1098_s16   ;;  %s814_s15 = sphi %s855_s15, %s1097_s15   ;;  %s810_s14 = sphi %s853_s14, %s1096_s14   ;;  %s806_s13 = sphi %s851_s13, %s1095_s13   ;;  %s802_s12 = sphi %s849_s12, %s1094_s12  }
   0x7   : > { %p29_p0 = scmp.ge.s32.totalorder %s28_s19, 2  ;;  %s40_s20 = sadd.s32 1, %s810_s14 }
   0x8   : > { %p47_p1 = scmp.ne.s32.totalorder %s810_s14, %s806_s13  ;;  %p48_p2 = scmp.eq.s32.totalorder %s822_s17, 0 }
   0x9   : > { %s1100_s19 = smov (%p29_p0, %s28_s19), 0  ;;  %p53_p4 = scmp.ne.s32.totalorder %s806_s13, %s802_s12 }
   0xa   : > { %p49_p3 = por %p48_p2, %p47_p1  ;;  %s36_s21 = ssub.s32 %s818_s16, %s1100_s19 }
   0xb   : > { %p54_p5 = scmp.eq.s32.totalorder %s584_s18, 0  ;;  %p38_p6 = scmp.eq.s32.totalorder %s36_s21, 0 }
   0xc   : > { %p625_p8 = scmp.lt.s32.totalorder %s822_s17, 2  ;;  %s161_s24 = sand.u32 1, %s810_s14  }
   0xd   : > { %p890_p7 = por %p54_p5, %p53_p4  ;;  %s900_s25 = sshll.u32 %s818_s16, 7 }
   0xe   : > { %s896_s23 = scalar_select %p38_p6, %s810_s14, %s40_s20  }
   0xf   : > { %s1083_s22 = scalar_select %p890_p7, 1, 0 }
  0x10   : > { %s904_s26 = sshll.u32 %s161_s24, 3  ;;  %p906_p9 = pnand %p625_p8, %p49_p3 }
  0x11   : > { %s182_s28 = sand.u32 1, %s822_s17   ;;  %s915_s4 = scalar_lea.hbm %s1077_s1, %s900_s25 }
  0x12   : > { %s1084_s27 = scalar_select %p906_p9, 1, 0 }
  0x13   : > { %s186_s5 = scalar_lea.vmem [#allocation4], %s904_s26  ;;  %s921_s7 = scalar_lea.sflag [#allocation5], %s182_s28 }
  0x14   : > { %s196_s6 = sshll.u32 %s186_s5, 4  ;;  %s678_s8 = scalar_lea.hbm %s915_s4, 128  ;;  %s918_s6 = int_to_ptr.vmem [resolvable:$true] %s196_s6 }
  0x15   : > { %p679_p11 = scmp.ne.s32.totalorder %s915_s4, %s678_s8  ;;  %p927_p12 = pneg %p906_p9 }
  0x16   : > { %s683_s12 = scalar_lea.hbm %s1077_s1, 256  ;;  %p684_p1 = scmp.lt.u32.totalorder %s915_s4, %s1077_s1 }
  0x17   : > { %p681_p13 = pnand %p927_p12, %p679_p11  ;;  %p685_p2 = scmp.lt.u32.totalorder %s683_s12, %s678_s8 }
  0x18   : > { %p687_p4 = scmp.lt.u32.totalorder %s678_s8, %s915_s4 }
  0x19   : > { %p682_p0 = pneg %p681_p13  ;;  %p686_p3 = por %p685_p2, %p684_p1 }
  0x1b   : > { %p688_p5 = por %p687_p4, %p686_p3 }
  0x1d   : > { %p689_p6 = pnand %p688_p5, %p682_p0 }
  0x1f   : > { %692 = shalt.err (!%p689_p6)
}
  0x20   : > { %s693_s28 = scalar_lea.vmem %s918_s6, 128  ;;  %s824_s29 = smov [#allocation4]  }
  0x21   : > { %p694_p8 = scmp.ne.s32.totalorder %s918_s6, %s693_s28  ;;  %s698_s30 = sshll.u32 %s824_s29, 4  ;;  %s699_s30 = int_to_ptr.vmem [resolvable:$false] %s698_s30 }
  0x22   : > { %s700_s5 = scalar_lea.vmem %s699_s30, 256  ;;  %p701_p10 = scmp.lt.s32.totalorder %s918_s6, %s699_s30 }
  0x23   : > { %p696_p11 = pnand %p694_p8, %p927_p12  ;;  %p702_p7 = scmp.lt.s32.totalorder %s700_s5, %s693_s28 }
  0x25   : > { %p697_p13 = pneg %p696_p11  ;;  %p703_p1 = por %p702_p7, %p701_p10 }
  0x27   : > { %p704_p2 = pnand %p703_p1, %p697_p13 }
  0x29   : > { %707 = shalt.err (!%p704_p2)
}
  0x2a   : > { %621 = dma.hbm_to_vmem [thread:$0]  (!%p906_p9), %s915_s4, 128, %s918_s6, %s921_s7  }
  0x2b   : > { %p222_p0 = scmp.lt.s32.totalorder %s822_s17, 3  ;;  %p1086_p3 = scmp.ge.s32.totalorder %s822_s17, 1 }
  0x2c   : > { %s962_s12 = scalar_lea.hbm %s1076_s0, %s900_s25  ;;  %s165_s20 = scalar_lea.vmem [#allocation2], %s904_s26 }
  0x2d   : > { %p954_p4 = pnand %p1086_p3, %p222_p0  ;;  %s175_s21 = sshll.u32 %s165_s20, 4  ;;  %s176_s21 = int_to_ptr.vmem [resolvable:$true] %s175_s21 }
  0x2e   : > { %s162_s4 = scalar_lea.sflag [#allocation3], %s161_s24  ;;  %s708_s6 = scalar_lea.hbm %s962_s12, 128 }
  0x2f   : > { %s1087_s8 = scalar_select %p954_p4, 1, 0 }
  0x30   : > { %p709_p7 = scmp.ne.s32.totalorder %s962_s12, %s708_s6  ;;  %s713_s30 = scalar_lea.hbm %s1076_s0, 256 }
  0x31   : > { %p714_p6 = scmp.lt.u32.totalorder %s962_s12, %s1076_s0  ;;  %p715_p8 = scmp.lt.u32.totalorder %s713_s30, %s708_s6 }
  0x32   : > { %p711_p10 = pnand %p709_p7, %p927_p12  ;;  %p717_p13 = scmp.lt.u32.totalorder %s708_s6, %s962_s12 }
  0x33   : > { %p716_p11 = por %p715_p8, %p714_p6 }
  0x34   : > { %p712_p5 = pneg %p711_p10 }
  0x35   : > { %p718_p1 = por %p717_p13, %p716_p11 }
  0x37   : > { %p719_p2 = pnand %p718_p1, %p712_p5 }
  0x39   : > { %722 = shalt.err (!%p719_p2)
}
  0x3a   : > { %s723_s24 = scalar_lea.vmem %s176_s21, 128  ;;  %s825_s11 = smov [#allocation2]  }
  0x3b   : > { %p724_p0 = scmp.ne.s32.totalorder %s176_s21, %s723_s24  ;;  %s728_s20 = sshll.u32 %s825_s11, 4  ;;  %s729_s20 = int_to_ptr.vmem [resolvable:$false] %s728_s20 }
  0x3c   : > { %s730_s28 = scalar_lea.vmem %s729_s20, 256  ;;  %p731_p10 = scmp.lt.s32.totalorder %s176_s21, %s729_s20 }
  0x3d   : > { %p726_p3 = pnand %p724_p0, %p927_p12  ;;  %p732_p4 = scmp.lt.s32.totalorder %s730_s28, %s723_s24 }
  0x3f   : > { %p727_p7 = pneg %p726_p3  ;;  %p733_p9 = por %p732_p4, %p731_p10 }
  0x41   : > { %p734_p6 = pnand %p733_p9, %p727_p7 }
  0x43   : > { %737 = shalt.err (!%p734_p6)
}
  0x44   : > { %p1088_p8 = scmp.ne.s32.totalorder %s1084_s27, 0  ;;  %s988_s30 = scalar_lea.hbm %s1078_s2, %s900_s25 }
  0x45   : > { %s207_s5 = scalar_lea.vmem [#allocation6], %s904_s26  ;;  %s738_s24 = scalar_lea.hbm %s988_s30, 128 }
  0x46   : > { %618 = dma.hbm_to_vmem [thread:$0]  (!%p1088_p8), %s962_s12, 128, %s176_s21, %s162_s4  }
  0x47   : > { %s217_s10 = sshll.u32 %s207_s5, 4  ;;  %p739_p9 = scmp.ne.s32.totalorder %s988_s30, %s738_s24  ;;  %s218_s10 = int_to_ptr.vmem [resolvable:$true] %s217_s10 }
  0x48   : > { %s743_s12 = scalar_lea.hbm %s1078_s2, 256  ;;  %p744_p11 = scmp.lt.u32.totalorder %s988_s30, %s1078_s2 }
  0x49   : > { %p741_p4 = pnand %p739_p9, %p927_p12  ;;  %p745_p13 = scmp.lt.u32.totalorder %s743_s12, %s738_s24 }
  0x4a   : > { %p747_p2 = scmp.lt.u32.totalorder %s738_s24, %s988_s30 }
  0x4b   : > { %p742_p5 = pneg %p741_p4  ;;  %p746_p1 = por %p745_p13, %p744_p11 }
  0x4d   : > { %p748_p0 = por %p747_p2, %p746_p1 }
  0x4f   : > { %p749_p3 = pnand %p748_p0, %p742_p5 }
  0x51   : > { %752 = shalt.err (!%p749_p3)
}
  0x52   : > { %s753_s25 = scalar_lea.vmem %s218_s10, 128  ;;  %s826_s26 = smov [#allocation6]  }
  0x53   : > { %p754_p7 = scmp.ne.s32.totalorder %s218_s10, %s753_s25  ;;  %s758_s28 = sshll.u32 %s826_s26, 4  ;;  %s759_s28 = int_to_ptr.vmem [resolvable:$false] %s758_s28 }
  0x54   : > { %s760_s6 = scalar_lea.vmem %s759_s28, 256  ;;  %p761_p9 = scmp.lt.s32.totalorder %s218_s10, %s759_s28 }
  0x55   : > { %p756_p10 = pnand %p754_p7, %p927_p12  ;;  %p762_p4 = scmp.lt.s32.totalorder %s760_s6, %s753_s25 }
  0x57   : > { %p757_p6 = pneg %p756_p10  ;;  %p763_p8 = por %p762_p4, %p761_p9 }
  0x59   : > { %p764_p11 = pnand %p763_p8, %p757_p6 }
  0x5b   : > { %767 = shalt.err (!%p764_p11)
}
  0x5c   : > { %p1089_p13 = scmp.ne.s32.totalorder %s1084_s27, 0  ;;  %p1090_p5 = scmp.ne.s32.totalorder %s1087_s8, 0 }
  0x5d   : > { %s228_s9 = sand.u32 (!%p1090_p5), 1, %s806_s13   ;;  %p1091_p12 = scmp.ne.s32.totalorder (!%p1090_p5), %s1083_s22, 0 }
  0x5e   : > { %624 = dma.hbm_to_vmem [thread:$0]  (!%p1089_p13), %s988_s30, 128, %s218_s10, %s921_s7  }
  0x5f   : > { %226 = sbr.rel (%p1090_p5) target bundleno = 286 (0x11e), region = 32  ;;  %s598_s29 = sshll.u32 (!%p1090_p5), %s228_s9, 3 }
  0x60   : > { %s229_s5 = scalar_lea.sflag (!%p1090_p5), [#allocation3], %s228_s9  ;;  %s232_s24 = scalar_lea.vmem (!%p1090_p5), [#allocation2], %s598_s29 }
  0x66   : > { %793 = dma.done.wait (%p1091_p12), %s229_s5, 128  }
  0x67   : > { %795 = vsyncadd (%p1091_p12), %s229_s5, 4294967168  ;;  %s237_s27 = sand.u32 1, %s584_s18   ;;  %s241_s7 = scalar_lea.vmem [#allocation4], %s598_s29 }
  0x68   : > { %s238_s11 = scalar_lea.sflag [#allocation5], %s237_s27 }
  0x69   : > { %797 = dma.done.wait (%p1091_p12), %s238_s11, 256  }
  0x6a   : > { %799 = vsyncadd (%p1091_p12), %s238_s11, 4294967040  ;;  %v314_v0 = vlaneseq  ;;  %v827_v1 = vmov 1983009808   ;;  %s250_s8 = scalar_lea.vmem [#allocation6], %s598_s29  ;;  %v298_v7 = vld [vmem:[%s241_s7] sm:$0xff]  ;;  %v295_v8 = vld [vmem:[%s232_s24] sm:$0xff] }
  0x6b   : > { %v312_v2 = vunpack.c.l.s4 %v827_v1  ;;  %v296_v6 = vld [vmem:[%s250_s8] sm:$0xff]  ;;  %vm299_vm1 = vcmp.gt.f32.partialorder %v298_v7, 0.5  ;;  %v301_v9 = vsub.f32 1.0, %v295_v8  ;;  %vm331_vm2 = vcmask 1041408   ;;  %p288_p8 = scmp.lt.s32.totalorder %s814_s15, 1 }
  0x6c   : > { %v315_v3 = vshrl.u32 %v314_v0, 7  ;;  %vm297_vm0 = vcmp.gt.f32.partialorder %v296_v6, 0.5  ;;  %v828_v10 = vmov 0.0   ;;  %v439_v6 = vand.u32 127, %v314_v0 }
  0x6d   : > { %v313_v4 = vunpack.c.0.s8 %v312_v2  ;;  %v603_v11 = vsel %vm297_vm0, 1.0, %v828_v10  ;;  %vm1025_vm3 = vmand %vm299_vm1, %vm297_vm0  ;;  %s1102_s15 = smov (!%p288_p8, %s814_s15), 1 }
  0x6e   : > { %v408_v13 = vcombine.high %v603_v11, %v603_v11  ;;  %v602_v15 = vsel %vm1025_vm3, 1.0, %v828_v10  ;;  %v302_v16 = vsel %vm1025_vm3, %v295_v8, %v301_v9  ;;  %vm443_vm4 = vcmp.eq.s32.totalorder %v439_v6, 3  ;;  %s601_s18 = sshll.u32 %s1102_s15, 1 }
  0x6f   : > { %v316_v5 = vsub.s32 %v313_v4, %v315_v3  ;;  %v344_v17 = vcombine.high %v602_v15, %v602_v15  ;;  %676 = vlog2.f32 %v302_v16  ;;  %vm442_vm5 = vcmp.eq.s32.totalorder %v439_v6, 2  ;;  %s294_s10 = scalar_lea.vmem %s1079_s3, %s601_s18 }
  0x70   : > { %vm441_vm6 = vcmp.eq.s32.totalorder %v439_v6, 1  ;;  %vm440_vm7 = vcmp.eq.s32.totalorder %v439_v6, 0 }
  0x71   : > { %v415_v14 = vrot.slane %v603_v11, %v316_v5  ;;  %v351_v18 = vrot.slane %v602_v15, %v316_v5  ;;  %v422_v19 = vrot.slane %v408_v13, %v316_v5  ;;  %v358_v22 = vrot.slane %v344_v17, %v316_v5 }
  0x73   : > { %v423_v20 = vcombine.high %v415_v14, %v415_v14  ;;  %v429_v21 = vsel %vm331_vm2, %v415_v14, 0.0  ;;  %v359_v23 = vcombine.high %v351_v18, %v351_v18  ;;  %v365_v24 = vsel %vm331_vm2, %v351_v18, 0.0 }
  0x74   : > { %v424_v25 = vcombine.high %v422_v19, %v422_v19  ;;  %v432_v27 = vsel %vm331_vm2, %v422_v19, 0.0  ;;  %v360_v29 = vcombine.high %v358_v22, %v358_v22  ;;  %v368_v31 = vsel %vm331_vm2, %v358_v22, 0.0 }
  0x75   : > { %v430_v26 = vsel %vm331_vm2, %v423_v20, 0.0  ;;  %v366_v30 = vsel %vm331_vm2, %v359_v23, 0.0 }
  0x76   : > { %v431_v28 = vadd.f32 %v430_v26, %v429_v21  ;;  %v434_v32 = vsel %vm331_vm2, %v424_v25, 0.0  ;;  %v367_v33 = vadd.f32 %v366_v30, %v365_v24  ;;  %v370_v35 = vsel %vm331_vm2, %v360_v29, 0.0 }
  0x78   : > { %v433_v34 = vadd.f32 %v432_v27, %v431_v28  ;;  %v369_v36 = vadd.f32 %v368_v31, %v367_v33 }
  0x79   : > { %v677_v39 = vpop.eup %676 }
  0x7a   : > { %v435_v37 = vadd.f32 %v434_v32, %v433_v34  ;;  %v371_v38 = vadd.f32 %v370_v35, %v369_v36  ;;  %v304_v40 = vmul.f32 0.6931472, %v677_v39 }
  0x7c   : > { %436 = vadd.xlane.f32.xlu0 %v435_v37  ;;  %372 = vadd.xlane.f32.xlu1 %v371_v38  ;;  %v305_v41 = vmax.f32 %v304_v40, -100.0 }
  0x7e   : > { %v306_v42 = vsub.f32 0.0, %v305_v41 }
  0x80   : > { %v307_v43 = vsel %vm297_vm0, %v306_v42, 0.0 }
  0x81   : > { %v375_v44 = vcombine.high %v307_v43, %v307_v43  ;;  %v382_v45 = vrot.slane %v307_v43, %v316_v5  ;;  %v308_v46 = vsel %vm1025_vm3, %v307_v43, 0.0 }
  0x82   : > { %v310_v47 = vcombine.high %v308_v46, %v308_v46  ;;  %v317_v48 = vrot.slane %v308_v46, %v316_v5 }
  0x83   : > { %v389_v49 = vrot.slane %v375_v44, %v316_v5  ;;  %v390_v50 = vcombine.high %v382_v45, %v382_v45  ;;  %v396_v51 = vsel %vm331_vm2, %v382_v45, 0.0 }
  0x84   : > { %v324_v52 = vrot.slane %v310_v47, %v316_v5  ;;  %v325_v53 = vcombine.high %v317_v48, %v317_v48  ;;  %v332_v54 = vsel %vm331_vm2, %v317_v48, 0.0 }
  0x85   : > { %v391_v55 = vcombine.high %v389_v49, %v389_v49  ;;  %v397_v56 = vsel %vm331_vm2, %v390_v50, 0.0  ;;  %v399_v57 = vsel %vm331_vm2, %v389_v49, 0.0 }
  0x86   : > { %v398_v58 = vadd.f32 %v397_v56, %v396_v51  ;;  %v326_v59 = vcombine.high %v324_v52, %v324_v52  ;;  %v333_v60 = vsel %vm331_vm2, %v325_v53, 0.0  ;;  %v335_v61 = vsel %vm331_vm2, %v324_v52, 0.0 }
  0x87   : > { %v401_v62 = vsel %vm331_vm2, %v391_v55, 0.0  ;;  %v334_v63 = vadd.f32 %v333_v60, %v332_v54 }
  0x88   : > { %v400_v1 = vadd.f32 %v399_v57, %v398_v58  ;;  %v337_v2 = vsel %vm331_vm2, %v326_v59, 0.0 }
  0x89   : > { %v336_v3 = vadd.f32 %v335_v61, %v334_v63 }
  0x8a   : > { %v402_v4 = vadd.f32 %v401_v62, %v400_v1 }
  0x8b   : > { %v338_v5 = vadd.f32 %v337_v2, %v336_v3 }
  0x8c   : > { %403 = vadd.xlane.f32.xlu0 %v402_v4 }
  0x8d   : > { %339 = vadd.xlane.f32.xlu1 %v338_v5 }
 0x109   : > { %v437_v7 = vpop.xlane.xlu0 %436  ;;  %v373_v8 = vpop.xlane.xlu1 %372 }
 0x10a   : > { %v444_v9 = vsel %vm443_vm4, %v437_v7, 0.0 }
 0x119   : > { %v404_v10 = vpop.xlane.xlu0 %403 }
 0x11a   : > { %v445_v11 = vsel %vm442_vm5, %v404_v10, %v444_v9  ;;  %v340_v12 = vpop.xlane.xlu1 %339 }
 0x11b   : > { %v446_v13 = vsel %vm441_vm6, %v373_v8, %v445_v11 }
 0x11c   : > { %v447_v14 = vsel %vm440_vm7, %v340_v12, %v446_v13 }
 0x11d   : > { %448 = vst [vmem:[%s294_s10] sm:$0x3] %v447_v14 }
 0x11e PF: > { %s19_s17 = sadd.s32 1, %s822_s17   ;;  %s1094_s12 = smov %s806_s13 }
 0x11f   : > { %p16_p1 = scmp.ge.s32.totalorder %s19_s17, 4   ;;  %s1095_s13 = smov %s810_s14 }
 0x120   : > { %s1096_s14 = smov %s896_s23  ;;  %s1097_s15 = smov %s818_s16 }
 0x121   : > { %s1098_s16 = smov %s1100_s19  ;;  %18 = sbr.rel (!%p16_p1) target bundleno = 6 (0x6), region = 96 }
 0x128   :  { %474 = vsyncpa [#allocation3], 1 }
 0x129   :  { %476 = vsyncpa [#allocation3 + $0x1], 1 }
 0x12a   :  { %477 = vsyncpa [#allocation5], 1 }
 0x12b   :  { %479 = vsyncpa [#allocation5 + $0x1], 1 }

</bundles_post_ra>
